<compile_context>
chip_gen: v6e
topology: v6e:2x2x1
jax: 0.10.0
libtpu: 0.0.40
codegen_flags: <defaults>
</compile_context>

<pallas_src>
import functools

import jax
import jax.numpy as jnp
from jax.experimental import pallas as pl
from jax.experimental.pallas import tpu as pltpu


def _ssd_loss_kernel(ploc_ref, logits_ref, gloc_ref, glabel_ref, out_ref,
                     acc_ref, *, alpha, A, TA, npa, needs_mask, exp_dtype):
    s_idx = pl.program_id(0)          # anchor-split half (size 1 or 2)
    a_idx = pl.program_id(2)          # anchor tile within this half

    # ---- init per-(image, half) accumulator at the first anchor tile ----------
    @pl.when(a_idx == 0)
    def _():
        acc_ref[...] = jnp.zeros_like(acc_ref)

    ploc = ploc_ref[0]                # (4, TA)  f32
    gloc = gloc_ref[0]                # (4, TA)  f32
    logits = logits_ref[0]            # (C, TA)  f32
    labels = glabel_ref[0]            # (1, TA)  i32

    # ---- Lloc: SmoothL1(ploc, gloc) summed over coords, positives only --------
    d = ploc - gloc
    ad = jnp.abs(d)
    sl1 = jnp.where(ad < 1.0, 0.5 * d * d, ad - 0.5)               # (4, TA)
    sl1_anchor = jnp.sum(sl1, axis=0, keepdims=True)               # (1, TA)

    # ---- Lconf: per-anchor cross entropy (reduce=False) -----------------------
    # ce = logsumexp(logits) - logits[label] = (lse + m) - sel
    m = jnp.max(logits, axis=0, keepdims=True)                     # (1, TA)
    # exp consumes (logits - m) immediately -> no second (C, TA) temp stays live
    exp_t = jnp.exp((logits - m).astype(exp_dtype)).astype(jnp.float32)
    lse = jnp.log(jnp.sum(exp_t, axis=0, keepdims=True))           # (1, TA)
    cls_ids = jax.lax.broadcasted_iota(jnp.int32, logits.shape, 0) # (C, TA)
    sel = jnp.sum(jnp.where(cls_ids == labels, logits, 0.0),
                  axis=0, keepdims=True)                           # (1, TA)
    ce = (lse + m) - sel                                           # (1, TA)

    pos = labels > 0                                               # (1, TA)
    if needs_mask:
        # only emitted when a partial / duplicated (clamped) tile can occur
        blk = s_idx * npa + a_idx
        anchor_ids = blk * TA + jax.lax.broadcasted_iota(jnp.int32, (1, TA), 1)
        valid = anchor_ids < A
        pos = jnp.logical_and(pos, valid)
        ce = jnp.where(valid, ce, 0.0)

    npos_tile = jnp.where(pos, 1.0, 0.0)                           # (1, TA)
    loss_tile = ce + alpha * jnp.where(pos, sl1_anchor, 0.0)       # (1, TA)

    # single RMW into the merged accumulator: row 0 = loss, row 1 = n_pos
    row = jax.lax.broadcasted_iota(jnp.int32, (2, TA), 0)
    acc_ref[...] += jnp.where(row == 0, loss_tile, npos_tile)

    # ---- finalize at the last anchor tile: single cross-lane reduce -----------
    @pl.when(a_idx == pl.num_programs(2) - 1)
    def _():
        acc = acc_ref[...]
        loss_sum = jnp.sum(acc[0:1, :])
        npos_sum = jnp.sum(acc[1:2, :])
        lane = jax.lax.broadcasted_iota(jnp.int32, (1, 1, 1, 128), 3)
        out_ref[...] = jnp.where(lane == 0, loss_sum,
                                 jnp.where(lane == 1, npos_sum, 0.0))


def ssd_loss(x, c, l, g, alpha=1.0, ta=8192, exp_dtype=jnp.float32,
             split_anchors=None):
    """x=(B,4,A) pred locs, c=(B,C,A) pred logits, l=(B,4,A) gt locs, g=(B,A) labels."""
    B, _, A = x.shape
    C = c.shape[1]

    # With B >= 2 the batch axis already feeds both v7x TensorCores; at B == 1
    # split the anchor range in two on a leading parallel axis instead.
    if split_anchors is None:
        split_anchors = B < 2
    n_splits = 2 if split_anchors else 1

    def round_up(v, m):
        return ((v + m - 1) // m) * m

    # VMEM working-set budget (v7x has only 64 MiB physical VMEM):
    #   double-buffered input blocks ~ 2*(C+9)*TA*4 B, plus ~3 live (C,TA) f32 temps.
    bytes_per_lane = (2 * (C + 9) + 3 * C) * 4
    ta_budget = max(128, ((36 * 1024 * 1024) // bytes_per_lane) // 128 * 128)
    ta = int(max(128, min(ta, ta_budget, round_up(pl.cdiv(A, n_splits), 128))))

    n_blocks = pl.cdiv(A, ta)                 # total anchor blocks
    npa = pl.cdiv(n_blocks, n_splits)         # anchor blocks per split
    # mask needed iff a partial tail tile or a clamped duplicate tile can occur
    needs_mask = (A % ta != 0) or (n_splits * npa != n_blocks)

    g3 = g.reshape(B, 1, A).astype(jnp.int32)

    def blk_idx(s, a):
        # clamp so the (possibly) extra tile of the second half stays in bounds;
        # its lanes are masked out in the kernel via anchor_ids >= A.
        return jnp.minimum(s * npa + a, n_blocks - 1)

    ws_bytes = bytes_per_lane * ta + 2 * ta * 4
    vmem_limit = int(min(48 * 1024 * 1024,
                         max(32 * 1024 * 1024, (ws_bytes * 5) // 4)))

    cost = pl.CostEstimate(
        flops=int(6 * B * C * A + 20 * B * A),
        transcendentals=int(B * (C + 1) * A),
        bytes_accessed=int(B * (C + 9) * A * 4 + n_splits * B * 128 * 4),
    )

    kernel = functools.partial(
        _ssd_loss_kernel, alpha=float(alpha), A=A, TA=ta, npa=npa,
        needs_mask=needs_mask, exp_dtype=exp_dtype)

    out = pl.pallas_call(
        kernel,
        out_shape=jax.ShapeDtypeStruct((n_splits, B, 1, 128), jnp.float32),
        grid_spec=pltpu.PrefetchScalarGridSpec(
            num_scalar_prefetch=0,
            grid=(n_splits, B, npa),
            in_specs=[
                pl.BlockSpec((1, 4, ta), lambda s, b, a: (b, 0, blk_idx(s, a))),
                pl.BlockSpec((1, C, ta), lambda s, b, a: (b, 0, blk_idx(s, a))),
                pl.BlockSpec((1, 4, ta), lambda s, b, a: (b, 0, blk_idx(s, a))),
                pl.BlockSpec((1, 1, ta), lambda s, b, a: (b, 0, blk_idx(s, a))),
            ],
            out_specs=pl.BlockSpec((1, 1, 1, 128), lambda s, b, a: (s, b, 0, 0)),
            scratch_shapes=[
                pltpu.VMEM((2, ta), jnp.float32),  # row 0: loss partial, row 1: n_pos
            ],
        ),
        compiler_params=pltpu.CompilerParams(
            dimension_semantics=("parallel", "parallel", "arbitrary"),
            vmem_limit_bytes=vmem_limit,
        ),
        cost_estimate=cost,
    )(x, c, l, g3)

    # combine per-half raw partials, then apply the /N normalization per image
    loss_p = out[:, :, 0, 0].sum(axis=0)      # (B,)
    npos_p = out[:, :, 0, 1].sum(axis=0)      # (B,)
    per_image = loss_p / jnp.maximum(npos_p, 1.0)
    per_image = jnp.where(npos_p > 0, per_image, 0.0)
    return per_image.mean()


def ssd_loss_ref(x, c, l, g, alpha=1.0):
    """Pure-JAX reference with identical semantics."""
    d = x - l
    ad = jnp.abs(d)
    sl1 = jnp.where(ad < 1.0, 0.5 * d * d, ad - 0.5).sum(axis=1)     # (B, A)
    pos = (g > 0).astype(jnp.float32)                                 # (B, A)
    loc_loss = (sl1 * pos).sum(axis=1)                                # (B,)

    logz = jax.scipy.special.logsumexp(c, axis=1)                     # (B, A)
    sel = jnp.take_along_axis(c, g[:, None, :], axis=1)[:, 0, :]      # (B, A)
    conf_loss = (logz - sel).sum(axis=1)                              # (B,)

    n_pos = pos.sum(axis=1)
    per_image = (conf_loss + alpha * loc_loss) / jnp.maximum(n_pos, 1.0)
    per_image = jnp.where(n_pos > 0, per_image, 0.0)
    return per_image.mean()


if __name__ == "__main__":
    def run_case(key, B, A, C, **kw):
        k1, k2, k3, k4 = jax.random.split(key, 4)
        ploc = jax.random.normal(k1, (B, 4, A), dtype=jnp.float32)
        plabel = jax.random.normal(k2, (B, C, A), dtype=jnp.float32)
        gloc = jax.random.normal(k3, (B, 4, A), dtype=jnp.float32)
        # labels in [0, C); 0 acts as background (negative anchor)
        glabel = jax.random.randint(k4, (B, A), 0, C, dtype=jnp.int32)
        loss = jax.block_until_ready(ssd_loss(ploc, plabel, gloc, glabel, **kw))
        ref = jax.block_until_ready(ssd_loss_ref(ploc, plabel, gloc, glabel))
        assert jnp.allclose(loss, ref, atol=1e-3, rtol=1e-4), (B, A, C, kw, loss, ref)

    key = jax.random.PRNGKey(0)
    keys = jax.random.split(key, 4)

    # default path: whole-A anchor tile, one grid step per image
    run_case(keys[0], B=2, A=1024, C=16)
    # multi-tile accumulation path (grid=(1, B, 4))
    run_case(keys[1], B=2, A=1024, C=16, ta=256)
    # tail-masked partial tile (A not a multiple of the anchor tile)
    run_case(keys[2], B=2, A=1000, C=16)
    # B=1 -> 2-way anchor split (v7x megacore) with an odd block count
    # (exercises the clamped/masked duplicate tile)
    run_case(keys[3], B=1, A=1500, C=16, ta=512)

    print("KERNEL_OK")
</pallas_src>

<mosaic_0001>
module attributes {stable_mosaic.version = 11 : i64} {
  func.func @_ssd_loss_kernel(%arg0: i32, %arg1: i32, %arg2: i32, %arg3: memref<1x4x1024xf32, #tpu.memory_space<vmem>>, %arg4: memref<1x16x1024xf32, #tpu.memory_space<vmem>>, %arg5: memref<1x4x1024xf32, #tpu.memory_space<vmem>>, %arg6: memref<1x1x1024xi32, #tpu.memory_space<vmem>>, %arg7: memref<1x1x1x128xf32, #tpu.memory_space<vmem>>, %arg8: memref<2x1024xf32, #tpu.memory_space<vmem>>) attributes {dimension_semantics = [#tpu.dimension_semantics<parallel>, #tpu.dimension_semantics<parallel>, #tpu.dimension_semantics<arbitrary>], iteration_bounds = array<i64: 1, 2, 1>, scalar_prefetch = 0 : i64, scratch_operands = 1 : i64, tpu.core_type = #tpu.core_type<tc>, window_params = [{transform_indices = @transform_0, window_bounds = array<i64: 1, 4, 1024>}, {transform_indices = @transform_1, window_bounds = array<i64: 1, 16, 1024>}, {transform_indices = @transform_2, window_bounds = array<i64: 1, 4, 1024>}, {transform_indices = @transform_3, window_bounds = array<i64: 1, 1, 1024>}, {transform_indices = @transform_4, window_bounds = array<i64: 1, 1, 1, 128>}]} {
    %c0_i32 = arith.constant 0 : i32
    %0 = arith.cmpi eq, %arg2, %c0_i32 : i32
    %1 = arith.extui %0 : i1 to i32
    %c0_i32_0 = arith.constant 0 : i32
    %2 = arith.cmpi ne, %1, %c0_i32_0 : i32
    scf.if %2 {
      %cst_31 = arith.constant 0.000000e+00 : f32
      %64 = vector.broadcast %cst_31 : f32 to vector<2x1024xf32>
      %c0_32 = arith.constant 0 : index
      %c0_33 = arith.constant 0 : index
      %65 = vector.load %arg8[%c0_32, %c0_33] : memref<2x1024xf32, #tpu.memory_space<vmem>>, vector<2x1024xf32>
      tpu.vector_store %arg8[%c0_32, %c0_33], %64 {strides = array<i32>} : memref<2x1024xf32, #tpu.memory_space<vmem>>, vector<2x1024xf32>,
    } else {
    }
    %c0 = arith.constant 0 : index
    %c0_1 = arith.constant 0 : index
    %c0_2 = arith.constant 0 : index
    %3 = vector.load %arg3[%c0, %c0_1, %c0_2] : memref<1x4x1024xf32, #tpu.memory_space<vmem>>, vector<1x4x1024xf32>
    %4 = vector.shape_cast %3 : vector<1x4x1024xf32> to vector<4x1024xf32>
    %c0_3 = arith.constant 0 : index
    %c0_4 = arith.constant 0 : index
    %c0_5 = arith.constant 0 : index
    %5 = vector.load %arg5[%c0_3, %c0_4, %c0_5] : memref<1x4x1024xf32, #tpu.memory_space<vmem>>, vector<1x4x1024xf32>
    %6 = vector.shape_cast %5 : vector<1x4x1024xf32> to vector<4x1024xf32>
    %c0_6 = arith.constant 0 : index
    %c0_7 = arith.constant 0 : index
    %c0_8 = arith.constant 0 : index
    %7 = vector.load %arg4[%c0_6, %c0_7, %c0_8] : memref<1x16x1024xf32, #tpu.memory_space<vmem>>, vector<1x16x1024xf32>
    %8 = vector.shape_cast %7 : vector<1x16x1024xf32> to vector<16x1024xf32>
    %c0_9 = arith.constant 0 : index
    %c0_10 = arith.constant 0 : index
    %c0_11 = arith.constant 0 : index
    %9 = vector.load %arg6[%c0_9, %c0_10, %c0_11] : memref<1x1x1024xi32, #tpu.memory_space<vmem>>, vector<1x1x1024xi32>
    %10 = vector.shape_cast %9 : vector<1x1x1024xi32> to vector<1x1024xi32>
    %11 = arith.subf %4, %6 : vector<4x1024xf32>
    %12 = math.absf %11 : vector<4x1024xf32>
    %cst = arith.constant 1.000000e+00 : f32
    %13 = vector.broadcast %cst : f32 to vector<4x1024xf32>
    %14 = arith.cmpf olt, %12, %13 : vector<4x1024xf32>
    %cst_12 = arith.constant 5.000000e-01 : f32
    %15 = vector.broadcast %cst_12 : f32 to vector<4x1024xf32>
    %16 = arith.mulf %15, %11 : vector<4x1024xf32>
    %17 = arith.mulf %16, %11 : vector<4x1024xf32>
    %cst_13 = arith.constant 5.000000e-01 : f32
    %18 = vector.broadcast %cst_13 : f32 to vector<4x1024xf32>
    %19 = arith.subf %12, %18 : vector<4x1024xf32>
    %20 = arith.select %14, %17, %19 : vector<4x1024xi1>, vector<4x1024xf32>
    %cst_14 = arith.constant dense<0.000000e+00> : vector<1024xf32>
    %21 = vector.multi_reduction <add>, %20, %cst_14 [0] : vector<4x1024xf32> to vector<1024xf32>
    %22 = vector.shape_cast %21 : vector<1024xf32> to vector<1x1024xf32>
    %cst_15 = arith.constant dense<0xFF800000> : vector<1024xf32>
    %23 = vector.multi_reduction <maximumf>, %8, %cst_15 [0] : vector<16x1024xf32> to vector<1024xf32>
    %24 = vector.shape_cast %23 : vector<1024xf32> to vector<1x1024xf32>
    %25 = vector.broadcast %24 : vector<1x1024xf32> to vector<16x1024xf32>
    %26 = arith.subf %8, %25 : vector<16x1024xf32>
    %27 = math.exp %26 : vector<16x1024xf32>
    %cst_16 = arith.constant dense<0.000000e+00> : vector<1024xf32>
    %28 = vector.multi_reduction <add>, %27, %cst_16 [0] : vector<16x1024xf32> to vector<1024xf32>
    %29 = vector.shape_cast %28 : vector<1024xf32> to vector<1x1024xf32>
    %30 = math.log %29 : vector<1x1024xf32>
    %31 = tpu.iota {dimensions = array<i32: 0>} : vector<16x1024xi32>
    %32 = vector.broadcast %10 : vector<1x1024xi32> to vector<16x1024xi32>
    %33 = arith.cmpi eq, %31, %32 : vector<16x1024xi32>
    %cst_17 = arith.constant 0.000000e+00 : f32
    %34 = vector.broadcast %cst_17 : f32 to vector<16x1024xf32>
    %35 = arith.select %33, %8, %34 : vector<16x1024xi1>, vector<16x1024xf32>
    %cst_18 = arith.constant dense<0.000000e+00> : vector<1024xf32>
    %36 = vector.multi_reduction <add>, %35, %cst_18 [0] : vector<16x1024xf32> to vector<1024xf32>
    %37 = vector.shape_cast %36 : vector<1024xf32> to vector<1x1024xf32>
    %38 = arith.addf %30, %24 : vector<1x1024xf32>
    %39 = arith.subf %38, %37 : vector<1x1024xf32>
    %c0_i32_19 = arith.constant 0 : i32
    %40 = vector.broadcast %c0_i32_19 : i32 to vector<1x1024xi32>
    %41 = arith.cmpi sgt, %10, %40 : vector<1x1024xi32>
    %cst_20 = arith.constant 1.000000e+00 : f32
    %cst_21 = arith.constant 0.000000e+00 : f32
    %42 = vector.broadcast %cst_20 : f32 to vector<1x1024xf32>
    %43 = vector.broadcast %cst_21 : f32 to vector<1x1024xf32>
    %44 = arith.select %41, %42, %43 : vector<1x1024xi1>, vector<1x1024xf32>
    %cst_22 = arith.constant 0.000000e+00 : f32
    %45 = vector.broadcast %cst_22 : f32 to vector<1x1024xf32>
    %46 = arith.select %41, %22, %45 : vector<1x1024xi1>, vector<1x1024xf32>
    %cst_23 = arith.constant 1.000000e+00 : f32
    %47 = vector.broadcast %cst_23 : f32 to vector<1x1024xf32>
    %48 = arith.mulf %47, %46 : vector<1x1024xf32>
    %49 = arith.addf %39, %48 : vector<1x1024xf32>
    %50 = tpu.iota {dimensions = array<i32: 0>} : vector<2x1024xi32>
    %c0_24 = arith.constant 0 : index
    %c0_25 = arith.constant 0 : index
    %51 = vector.load %arg8[%c0_24, %c0_25] : memref<2x1024xf32, #tpu.memory_space<vmem>>, vector<2x1024xf32>
    %c0_i32_26 = arith.constant 0 : i32
    %52 = vector.broadcast %c0_i32_26 : i32 to vector<2x1024xi32>
    %53 = arith.cmpi eq, %50, %52 : vector<2x1024xi32>
    %54 = vector.shape_cast %49 : vector<1x1024xf32> to vector<1x1024xf32>
    %55 = vector.broadcast %54 : vector<1x1024xf32> to vector<2x1024xf32>
    %56 = vector.shape_cast %44 : vector<1x1024xf32> to vector<1x1024xf32>
    %57 = vector.broadcast %56 : vector<1x1024xf32> to vector<2x1024xf32>
    %58 = arith.select %53, %55, %57 : vector<2x1024xi1>, vector<2x1024xf32>
    %59 = arith.addf %51, %58 : vector<2x1024xf32>
    %c0_27 = arith.constant 0 : index
    %c0_28 = arith.constant 0 : index
    %60 = vector.load %arg8[%c0_27, %c0_28] : memref<2x1024xf32, #tpu.memory_space<vmem>>, vector<2x1024xf32>
    tpu.vector_store %arg8[%c0_27, %c0_28], %59 {strides = array<i32>} : memref<2x1024xf32, #tpu.memory_space<vmem>>, vector<2x1024xf32>,
    %c0_i32_29 = arith.constant 0 : i32
    %61 = arith.cmpi eq, %arg2, %c0_i32_29 : i32
    %62 = arith.extui %61 : i1 to i32
    %c0_i32_30 = arith.constant 0 : i32
    %63 = arith.cmpi ne, %62, %c0_i32_30 : i32
    scf.if %63 {
      %c0_31 = arith.constant 0 : index
      %c0_32 = arith.constant 0 : index
      %64 = vector.load %arg8[%c0_31, %c0_32] : memref<2x1024xf32, #tpu.memory_space<vmem>>, vector<2x1024xf32>
      %65 = vector.extract_strided_slice %64 {offsets = [0, 0], sizes = [1, 1024], strides = [1, 1]} : vector<2x1024xf32> to vector<1x1024xf32>
      %66 = vector.shape_cast %65 : vector<1x1024xf32> to vector<1x1x1024xf32>
      %cst_33 = arith.constant dense<0.000000e+00> : vector<1xf32>
      %67 = vector.multi_reduction <add>, %66, %cst_33 [1, 2] : vector<1x1x1024xf32> to vector<1xf32>
      %68 = vector.shape_cast %67 : vector<1xf32> to vector<1x1x1xf32>
      %69 = vector.extract %68[0, 0, 0] : f32 from vector<1x1x1xf32>
      %70 = vector.extract_strided_slice %64 {offsets = [1, 0], sizes = [1, 1024], strides = [1, 1]} : vector<2x1024xf32> to vector<1x1024xf32>
      %71 = vector.shape_cast %70 : vector<1x1024xf32> to vector<1x1x1024xf32>
      %cst_34 = arith.constant dense<0.000000e+00> : vector<1xf32>
      %72 = vector.multi_reduction <add>, %71, %cst_34 [1, 2] : vector<1x1x1024xf32> to vector<1xf32>
      %73 = vector.shape_cast %72 : vector<1xf32> to vector<1x1x1xf32>
      %74 = vector.extract %73[0, 0, 0] : f32 from vector<1x1x1xf32>
      %75 = tpu.iota {dimensions = array<i32: 3>} : vector<1x1x1x128xi32>
      %c0_i32_35 = arith.constant 0 : i32
      %76 = vector.broadcast %c0_i32_35 : i32 to vector<1x1x1x128xi32>
      %77 = arith.cmpi eq, %75, %76 : vector<1x1x1x128xi32>
      %c1_i32 = arith.constant 1 : i32
      %78 = vector.broadcast %c1_i32 : i32 to vector<1x1x1x128xi32>
      %79 = arith.cmpi eq, %75, %78 : vector<1x1x1x128xi32>
      %cst_36 = arith.constant 0.000000e+00 : f32
      %80 = vector.broadcast %74 : f32 to vector<1x1x1x128xf32>
      %81 = vector.broadcast %cst_36 : f32 to vector<1x1x1x128xf32>
      %82 = arith.select %79, %80, %81 : vector<1x1x1x128xi1>, vector<1x1x1x128xf32>
      %83 = vector.broadcast %69 : f32 to vector<1x1x1x128xf32>
      %84 = arith.select %77, %83, %82 : vector<1x1x1x128xi1>, vector<1x1x1x128xf32>
      %c0_37 = arith.constant 0 : index
      %c0_38 = arith.constant 0 : index
      %c0_39 = arith.constant 0 : index
      %c0_40 = arith.constant 0 : index
      %85 = vector.load %arg7[%c0_37, %c0_38, %c0_39, %c0_40] : memref<1x1x1x128xf32, #tpu.memory_space<vmem>>, vector<1x1x1x128xf32>
      tpu.vector_store %arg7[%c0_37, %c0_38, %c0_39, %c0_40], %84 {strides = array<i32>} : memref<1x1x1x128xf32, #tpu.memory_space<vmem>>, vector<1x1x1x128xf32>,
    } else {
    }
    return
  }
  func.func @transform_0(%arg0: i32, %arg1: i32, %arg2: i32) -> (i32, i32, i32) {
    %c1_i32 = arith.constant 1 : i32
    %0 = arith.muli %arg0, %c1_i32 : i32
    %1 = arith.addi %0, %arg2 : i32
    %c0_i32 = arith.constant 0 : i32
    %2 = arith.minsi %1, %c0_i32 : i32
    %c0_i32_0 = arith.constant 0 : i32
    %c0_i32_1 = arith.constant 0 : i32
    return %arg1, %c0_i32_0, %2 : i32, i32, i32
  }
  func.func @transform_1(%arg0: i32, %arg1: i32, %arg2: i32) -> (i32, i32, i32) {
    %c1_i32 = arith.constant 1 : i32
    %0 = arith.muli %arg0, %c1_i32 : i32
    %1 = arith.addi %0, %arg2 : i32
    %c0_i32 = arith.constant 0 : i32
    %2 = arith.minsi %1, %c0_i32 : i32
    %c0_i32_0 = arith.constant 0 : i32
    %c0_i32_1 = arith.constant 0 : i32
    return %arg1, %c0_i32_0, %2 : i32, i32, i32
  }
  func.func @transform_2(%arg0: i32, %arg1: i32, %arg2: i32) -> (i32, i32, i32) {
    %c1_i32 = arith.constant 1 : i32
    %0 = arith.muli %arg0, %c1_i32 : i32
    %1 = arith.addi %0, %arg2 : i32
    %c0_i32 = arith.constant 0 : i32
    %2 = arith.minsi %1, %c0_i32 : i32
    %c0_i32_0 = arith.constant 0 : i32
    %c0_i32_1 = arith.constant 0 : i32
    return %arg1, %c0_i32_0, %2 : i32, i32, i32
  }
  func.func @transform_3(%arg0: i32, %arg1: i32, %arg2: i32) -> (i32, i32, i32) {
    %c1_i32 = arith.constant 1 : i32
    %0 = arith.muli %arg0, %c1_i32 : i32
    %1 = arith.addi %0, %arg2 : i32
    %c0_i32 = arith.constant 0 : i32
    %2 = arith.minsi %1, %c0_i32 : i32
    %c0_i32_0 = arith.constant 0 : i32
    %c0_i32_1 = arith.constant 0 : i32
    return %arg1, %c0_i32_0, %2 : i32, i32, i32
  }
  func.func @transform_4(%arg0: i32, %arg1: i32, %arg2: i32) -> (i32, i32, i32, i32) {
    %c0_i32 = arith.constant 0 : i32
    %c0_i32_0 = arith.constant 0 : i32
    %c0_i32_1 = arith.constant 0 : i32
    return %arg0, %arg1, %c0_i32, %c0_i32_0 : i32, i32, i32, i32
  }
}

</mosaic_0001>

<bundles_post_ra>
// kernel: tpu_custom_call.1
= control target key start
LH: loop header
LB: loop body
LE: loop exit
PB: predicated region body
PF: predicated region fallthrough
CT: control target
= control target key end

     0   :  { %s2475_s0 = inlined_call_operand.hbm [shape: f32[2,4,1024], index: 0, kind: input, shape index: {}]   ;;  %s2476_s1 = inlined_call_operand.hbm [shape: f32[2,16,1024], index: 1, kind: input, shape index: {}]   ;;  %s2477_s2 = inlined_call_operand.hbm [shape: f32[2,4,1024], index: 2, kind: input, shape index: {}]   ;;  %s2478_s3 = inlined_call_operand.hbm [shape: s32[2,1,1024], index: 3, kind: input, shape index: {}]   ;;  %s2479_s4 = inlined_call_operand.hbm [shape: f32[1,2,1,128], index: 4, kind: output, shape index: {}]  }
   0x1   :  { %2491 = sst [smem:[#allocation27_spill]] %s2476_s1 }
   0x2   :  { %9 = vsyncpa [#allocation4], 0 }
   0x3   :  { %11 = vsyncpa [#allocation4 + $0x1], 0 }
   0x4   :  { %12 = vsyncpa [#allocation7], 0 }
   0x5   :  { %14 = vsyncpa [#allocation7 + $0x1], 0 }
   0x6   :  { %15 = vsyncpa [#allocation10], 0 }
   0x7   :  { %17 = vsyncpa [#allocation10 + $0x1], 0 }
   0x8   :  { %18 = vsyncpa [#allocation5], 0 }
   0x9   :  { %20 = vsyncpa [#allocation5 + $0x1], 0  ;;  %s1820_s15 = smov 0   ;;  %s1822_s16 = smov 0  }
   0xa   :  { %s1824_s17 = smov 0   ;;  %s1826_s18 = smov 0  }
   0xb   :  { %s1828_s19 = smov 0   ;;  %s1830_s20 = smov 0  }
   0xc LB: > { %2492 = sst [smem:[#allocation16_spill]] %s1771_s17  ;;  %s1851_s21 = sadd.s32 4294967295, %s1783_s20   ;;  %s1783_s20 = sphi %s1830_s20, %s26_s20   ;;  %s1779_s19 = sphi %s1828_s19, %s2532_s19   ;;  %s1775_s18 = sphi %s1826_s18, %s2531_s18   ;;  %s1771_s17 = sphi %s1824_s17, %s2527_s17   ;;  %s1767_s16 = sphi %s1822_s16, %s2530_s16   ;;  %s1763_s15 = sphi %s1820_s15, %s2529_s15  }
   0xd   : > { %s1418_s22 = sadd.s32 4294967294, %s1783_s20   ;;  %s41_s23 = sadd.s32 1, %s1779_s19 }
   0xe   : > { %s60_s24 = sadd.s32 1, %s1771_s17  ;;  %p43_p0 = scmp.ge.s32.totalorder %s41_s23, 2 }
   0xf   : > { %p67_p1 = scmp.ne.s32.totalorder %s1771_s17, %s1767_s16  ;;  %p68_p2 = scmp.eq.s32.totalorder %s1783_s20, 0 }
  0x10   : > { %p73_p3 = scmp.ne.s32.totalorder %s1767_s16, %s1763_s15  ;;  %s2534_s23 = smov (%p43_p0, %s41_s23), 0 }
  0x11   : > { %2493 = sst [smem:[#allocation17_spill]] %s2534_s23  ;;  %p1863_p4 = por %p68_p2, %p67_p1 }
  0x12   : > { %p74_p5 = scmp.eq.s32.totalorder %s1851_s21, 0  ;;  %s55_s26 = ssub.s32 %s1779_s19, %s2534_s23 }
  0x13   : > { %p201_p6 = scmp.eq.s32.totalorder %s1851_s21, 1  ;;  %p58_p7 = scmp.eq.s32.totalorder %s55_s26, 0 }
  0x14   : > { %p1871_p8 = por %p74_p5, %p73_p3  ;;  %p207_p10 = scmp.eq.s32.totalorder %s1418_s22, 1 }
  0x15   : > { %p1875_p9 = por %p201_p6, %p67_p1  ;;  %p1480_p13 = scmp.lt.s32.totalorder %s1783_s20, 2 }
  0x16   : > { %s1880_s29 = scalar_select %p58_p7, %s1771_s17, %s60_s24  }
  0x17   : > { %p1882_p11 = por %p207_p10, %p73_p3  ;;  %s1889_s5 = sand.u32 1, %s1771_s17  }
  0x18   : > { %2497 = sst [smem:[#allocation18_spill]] %s1880_s29  ;;  %s251_s6 = sand.u32 1, %s1783_s20  }
  0x19   : > { %s1424_s7 = sshll.u32 %s1889_s5, 7  ;;  %p1895_p0 = pnand %p1480_p13, %p1863_p4 }
  0x1a   : > { %s1446_s9 = sshll.u32 %s1779_s19, 11  ;;  %s2500_s1 = sld [smem:[#allocation27_spill]] }
  0x1b   : > { %s255_s13 = scalar_lea.vmem [#allocation6], %s1424_s7  ;;  %s1903_s22 = scalar_lea.sflag [#allocation7], %s251_s6 }
  0x1c   : > { %s267_s14 = sshll.u32 %s255_s13, 4  ;;  %p1585_p1 = pneg %p1895_p0  ;;  %s268_s14 = int_to_ptr.vmem [resolvable:$true] %s267_s14 }
  0x1d   : > { %s1596_s24 = scalar_lea.vmem %s268_s14, 2048  ;;  %s1785_s25 = smov [#allocation6]  }
  0x1e   : > { %p1597_p2 = scmp.ne.s32.totalorder %s268_s14, %s1596_s24  ;;  %s1601_s26 = sshll.u32 %s1785_s25, 4  ;;  %s1602_s26 = int_to_ptr.vmem [resolvable:$false] %s1601_s26 }
  0x1f   : > { %s1603_s23 = scalar_lea.vmem %s1602_s26, 4096  ;;  %p1604_p5 = scmp.lt.s32.totalorder %s268_s14, %s1602_s26 }
  0x20   : > { %s266_s12 = scalar_lea.hbm %s2500_s1, %s1446_s9  ;;  %p1599_p3 = pnand %p1597_p2, %p1585_p1 }
  0x21   : > { %p1605_p6 = scmp.lt.s32.totalorder %s1603_s23, %s1596_s24 }
  0x22   : > { %p1600_p4 = pneg %p1599_p3 }
  0x23   : > { %p1606_p7 = por %p1605_p6, %p1604_p5 }
  0x25   : > { %p1607_p10 = pnand %p1606_p7, %p1600_p4 }
  0x27   : > { %1610 = shalt.err (!%p1607_p10)
}
  0x28   : > { %s1786_s7 = smov 1024   ;;  %s1787_s6 = smov 64  }
  0x29   : > { %1469 = dma.hbm_to_vmem [thread:$0]  (!%p1895_p0), %s266_s12, 2048, %s268_s14, %s1903_s22, %s1786_s7, %s1786_s7, %s1787_s6  }
  0x2a   : > { %p1433_p13 = scmp.ge.s32.totalorder %s1783_s20, 1  ;;  %p323_p2 = scmp.lt.s32.totalorder %s1783_s20, 3 }
  0x2b   : > { %s1421_s23 = sshll.u32 %s1889_s5, 5  ;;  %s1445_s10 = sshll.u32 %s1779_s19, 9 }
  0x2c   : > { %p1915_p3 = pnand %p1433_p13, %p323_p2  ;;  %s242_s24 = scalar_lea.hbm %s2475_s0, %s1445_s10 }
  0x2d   : > { %s231_s25 = scalar_lea.vmem [#allocation3], %s1421_s23  ;;  %s1927_s17 = scalar_lea.hbm %s2477_s2, %s1445_s10 }
  0x2e   : > { %s244_s26 = sshll.u32 %s231_s25, 4  ;;  %s228_s12 = scalar_lea.sflag [#allocation4], %s1889_s5  ;;  %s245_s26 = int_to_ptr.vmem [resolvable:$true] %s244_s26 }
  0x2f   : > { %s1624_s14 = scalar_lea.vmem %s245_s26, 512  ;;  %s1788_s7 = smov [#allocation3]  }
  0x30   : > { %p1625_p4 = scmp.ne.s32.totalorder %s245_s26, %s1624_s14  ;;  %s1629_s6 = sshll.u32 %s1788_s7, 4  ;;  %s1630_s6 = int_to_ptr.vmem [resolvable:$false] %s1629_s6 }
  0x31   : > { %s1631_s11 = scalar_lea.vmem %s1630_s6, 1024  ;;  %p1632_p7 = scmp.lt.s32.totalorder %s245_s26, %s1630_s6 }
  0x32   : > { %p1627_p5 = pnand %p1625_p4, %p1585_p1  ;;  %p1633_p10 = scmp.lt.s32.totalorder %s1631_s11, %s1624_s14 }
  0x34   : > { %p1628_p6 = pneg %p1627_p5  ;;  %p1634_p13 = por %p1633_p10, %p1632_p7 }
  0x36   : > { %p1635_p2 = pnand %p1634_p13, %p1628_p6 }
  0x38   : > { %1638 = shalt.err (!%p1635_p2)
}
  0x39   : > { %1466 = dma.hbm_to_vmem [thread:$0]  (!%p1895_p0), %s242_s24, 512, %s245_s26, %s228_s12  }
  0x3a   : > { %s281_s1 = scalar_lea.vmem [#allocation8], %s1421_s23  ;;  %s1430_s10 = sshll.u32 %s1889_s5, 3 }
  0x3b   : > { %s294_s29 = sshll.u32 %s281_s1, 4  ;;  %s1789_s25 = smov [#allocation8]   ;;  %s295_s29 = int_to_ptr.vmem [resolvable:$true] %s294_s29 }
  0x3c   : > { %s1652_s13 = scalar_lea.vmem %s295_s29, 512  ;;  %s1657_s14 = sshll.u32 %s1789_s25, 4  ;;  %s1658_s14 = int_to_ptr.vmem [resolvable:$false] %s1657_s14 }
  0x3d   : > { %p1653_p4 = scmp.ne.s32.totalorder %s295_s29, %s1652_s13  ;;  %s1659_s7 = scalar_lea.vmem %s1658_s14, 1024 }
  0x3e   : > { %p1660_p6 = scmp.lt.s32.totalorder %s295_s29, %s1658_s14  ;;  %p1661_p7 = scmp.lt.s32.totalorder %s1659_s7, %s1652_s13 }
  0x3f   : > { %p1655_p5 = pnand %p1653_p4, %p1585_p1 }
  0x40   : > { %p1662_p10 = por %p1661_p7, %p1660_p6 }
  0x41   : > { %p1656_p12 = pneg %p1655_p5 }
  0x43   : > { %p1663_p13 = pnand %p1662_p10, %p1656_p12 }
  0x45   : > { %1666 = shalt.err (!%p1663_p13)
}
  0x46   : > { %1472 = dma.hbm_to_vmem [thread:$0]  (!%p1895_p0), %s1927_s17, 512, %s295_s29, %s1903_s22  }
  0x47   : > { %s1448_s23 = sshll.u32 %s1779_s19, 7  ;;  %s305_s6 = scalar_lea.vmem [#allocation9], %s1430_s10 }
  0x48   : > { %s316_s12 = scalar_lea.hbm %s2478_s3, %s1448_s23  ;;  %s318_s11 = sshll.u32 %s305_s6, 4  ;;  %s319_s11 = int_to_ptr.vmem [resolvable:$true] %s318_s11 }
  0x49   : > { %s302_s1 = scalar_lea.sflag [#allocation10], %s1889_s5  ;;  %s1680_s13 = scalar_lea.vmem %s319_s11, 128 }
  0x4a   : > { %p1681_p12 = scmp.ne.s32.totalorder %s319_s11, %s1680_s13  ;;  %s1790_s25 = smov [#allocation9]  }
  0x4b   : > { %s1685_s14 = sshll.u32 %s1790_s25, 4  ;;  %s1686_s14 = int_to_ptr.vmem [resolvable:$false] %s1685_s14 }
  0x4c   : > { %p1683_p2 = pnand %p1681_p12, %p1585_p1  ;;  %s1687_s7 = scalar_lea.vmem %s1686_s14, 256 }
  0x4d   : > { %p1688_p5 = scmp.lt.s32.totalorder %s319_s11, %s1686_s14  ;;  %p1689_p6 = scmp.lt.s32.totalorder %s1687_s7, %s1680_s13 }
  0x4e   : > { %p1684_p4 = pneg %p1683_p2 }
  0x4f   : > { %p1690_p7 = por %p1689_p6, %p1688_p5 }
  0x51   : > { %p1691_p10 = pnand %p1690_p7, %p1684_p4 }
  0x53   : > { %1694 = shalt.err (!%p1691_p10)
}
  0x54   : > { %1475 = dma.hbm_to_vmem [thread:$0]  (!%p1895_p0), %s316_s12, 128, %s319_s11, %s302_s1  }
  0x55   : > { %327 = sbr.rel (%p1915_p3) target bundleno = 458 (0x1ca), region = 36 }
  0x5a   : > { %s1956_s17 = sand.u32 1, %s1767_s16  }
  0x5b   : > { %s1434_s5 = sshll.u32 %s1956_s17, 5  ;;  %s330_s22 = scalar_lea.sflag [#allocation4], %s1956_s17 }
  0x5c   : > { %s333_s29 = scalar_lea.vmem [#allocation3], %s1434_s5 }
  0x5d   : > { %1746 = dma.done.wait (%p1871_p8), %s330_s22, 512  }
  0x5e   : > { %1748 = vsyncadd (%p1871_p8), %s330_s22, 4294966784  ;;  %s338_s8 = sand.u32 1, %s1851_s21   ;;  %s1435_s9 = sshll.u32 %s1956_s17, 7 }
  0x5f   : > { %s339_s10 = scalar_lea.sflag [#allocation7], %s338_s8  ;;  %s1966_s23 = scalar_lea.vmem [#allocation6], %s1435_s9 }
  0x60   : > { %1750 = dma.done.wait (%p1871_p8), %s339_s10, 2560  }
  0x61   : > { %1752 = vsyncadd (%p1871_p8), %s339_s10, 4294964736  ;;  %s1437_s24 = sshll.u32 %s1956_s17, 3  ;;  %s351_s26 = scalar_lea.vmem [#allocation8], %s1434_s5 }
  0x62   : > { %s357_s12 = scalar_lea.sflag [#allocation10], %s1956_s17  ;;  %s1974_s6 = scalar_lea.vmem [#allocation9], %s1437_s24 }
  0x63   : > { %1754 = dma.done.wait (%p1871_p8), %s357_s12, 128  }
  0x64   : > { %1756 = vsyncadd (%p1871_p8), %s357_s12, 4294967168  ;;  %v2482_v0 = vlaneseq  ;;  %v1791_v1 = vmov 1966171168   ;;  %v1792_v4 = vmov 1983009808   ;;  %v421_v6 = vld [vmem:[%s333_s29] sm:$0xff] }
  0x65   : > { %v873_v2 = vunpack.c.l.s4 %v1791_v1  ;;  %v1063_v5 = vunpack.c.l.s4 %v1792_v4  ;;  %v422_v7 = vld [vmem:[%s333_s29 + $0x8] sm:$0xff]  ;;  %v423_v8 = vld [vmem:[%s333_s29 + $0x10] sm:$0xff]  ;;  %vm486_vm0 = vcmask 1043456   ;;  %v424_v10 = vld [vmem:[%s333_s29 + $0x18] sm:$0xff]  ;;  %s1442_s21 = sshll.u32 %s1775_s18, 4  ;;  %s398_s11 = scalar_lea.vmem [#allocation11], %s1956_s17 }
  0x66   : > { %v1981_v3 = vshrl.u32 %v2482_v0, 7  ;;  %v425_v11 = vld [vmem:[%s351_s26] sm:$0xff]  ;;  %v426_v12 = vld [vmem:[%s351_s26 + $0x8] sm:$0xff]  ;;  %v427_v17 = vld [vmem:[%s351_s26 + $0x10] sm:$0xff]  ;;  %s1260_s1 = sshll.u32 %s398_s11, 4  ;;  %s2433_s7 = scalar_lea.hbm %s2479_s4, %s1442_s21  ;;  %s1261_s1 = int_to_ptr.vmem [resolvable:$true] %s1260_s1 }
  0x67   : > { %v874_v9 = vunpack.c.0.s8 %v873_v2  ;;  %v1064_v16 = vunpack.c.0.s8 %v1063_v5  ;;  %v428_v18 = vld [vmem:[%s351_s26 + $0x18] sm:$0xff]  ;;  %v446_v19 = vsub.f32 %v421_v6, %v425_v11  ;;  %v447_v20 = vsub.f32 %v422_v7, %v426_v12  ;;  %v1999_v23 = vld [vmem:[%s1966_s23] sm:$0xff]  ;;  %v2008_v28 = vld [vmem:[%s1966_s23 + $0x8] sm:$0xff]  ;;  %s1246_s5 = scalar_lea.sflag [#allocation5], %s1956_s17  ;;  %s1695_s18 = scalar_lea.vmem %s1261_s1, 16 }
  0x68   : > { %v1984_v13 = vadd.s32 8, %v1981_v3  ;;  %v1987_v14 = vsub.s32 0, %v1981_v3  ;;  %v1990_v15 = vsub.s32 1, %v1981_v3  ;;  %v1993_v21 = vsub.s32 2, %v1981_v3  ;;  %v2017_v33 = vld [vmem:[%s1966_s23 + $0x40] sm:$0xff]  ;;  %v2020_v34 = vld [vmem:[%s1966_s23 + $0x48] sm:$0xff]  ;;  %p1696_p8 = scmp.ne.s32.totalorder %s1261_s1, %s1695_s18 }
  0x69   : > { %v1996_v22 = vsub.s32 3, %v1981_v3  ;;  %v448_v24 = vsub.f32 %v423_v8, %v427_v17  ;;  %v449_v25 = vsub.f32 %v424_v10, %v428_v18  ;;  %v2002_v26 = vsub.s32 4, %v1981_v3  ;;  %s1794_s22 = smov [#allocation11]  }
  0x6a   : > { %v2005_v27 = vsub.s32 5, %v1981_v3  ;;  %v450_v29 = vand.u32 2147483647, %v446_v19  ;;  %v458_v30 = vmul.f32 0.5, %v446_v19  ;;  %v2011_v31 = vsub.s32 6, %v1981_v3  ;;  %p1697_p0 = pnand %p1696_p8, %p1875_p9  ;;  %s1699_s29 = sshll.u32 %s1794_s22, 4  ;;  %s1700_s29 = int_to_ptr.vmem [resolvable:$false] %s1699_s29 }
  0x6b   : > { %v2014_v32 = vsub.s32 7, %v1981_v3  ;;  %v451_v35 = vand.u32 2147483647, %v447_v20  ;;  %v459_v36 = vmul.f32 0.5, %v447_v20  ;;  %v2023_v37 = vsub.s32 %v874_v9, %v1981_v3  ;;  %s1701_s8 = scalar_lea.vmem %s1700_s29, 32  ;;  %p1702_p3 = scmp.lt.s32.totalorder %s1261_s1, %s1700_s29 }
  0x6c   : > { %v2026_v38 = vsub.s32 %v1064_v16, %v1981_v3  ;;  %v452_v39 = vand.u32 2147483647, %v448_v24  ;;  %vm2028_vm1 = vcmp.lt.f32.partialorder %v450_v29, 1.0  ;;  %v462_v41 = vmul.f32 %v458_v30, %v446_v19  ;;  %p1698_p1 = pneg %p1697_p0  ;;  %p1703_p13 = scmp.lt.s32.totalorder %s1701_s8, %s1695_s18 }
  0x6d   : > { %v2034_v42 = vmax.f32 %v1999_v23, %v2017_v33  ;;  %v453_v43 = vand.u32 2147483647, %v449_v25  ;;  %vm455_vm2 = vcmp.lt.f32.partialorder %v451_v35, 1.0  ;;  %v463_v44 = vmul.f32 %v459_v36, %v447_v20 }
  0x6e   : > { %2502 = vst [vmem:[#allocation19_spill] sm:$0xff] %v2026_v38  ;;  %v2038_v45 = vmax.f32 %v2008_v28, %v2020_v34  ;;  %vm2040_vm3 = vcmp.lt.f32.partialorder %v452_v39, 1.0  ;;  %v460_v47 = vmul.f32 0.5, %v448_v24  ;;  %v461_v48 = vmul.f32 0.5, %v449_v25  ;;  %p1704_p12 = por %p1703_p13, %p1702_p3 }
  0x6f   : > { %v1438_v49 = vadd.f32 -0.5, %v450_v29  ;;  %vm457_vm4 = vcmp.lt.f32.partialorder %v453_v43, 1.0  ;;  %v1439_v50 = vadd.f32 -0.5, %v451_v35  ;;  %v1440_v51 = vadd.f32 -0.5, %v452_v39 }
  0x70   : > { %v1441_v52 = vadd.f32 -0.5, %v453_v43  ;;  %v464_v53 = vmul.f32 %v460_v47, %v448_v24  ;;  %v465_v54 = vmul.f32 %v461_v48, %v449_v25  ;;  %v544_v56 = vrot.slane %v2034_v42, 4  ;;  %p1705_p2 = pnand %p1704_p12, %p1698_p1 }
  0x71   : > { %v470_v55 = vsel %vm2028_vm1, %v462_v41, %v1438_v49  ;;  %v471_v57 = vsel %vm455_vm2, %v463_v44, %v1439_v50  ;;  %v551_v60 = vrot.slane %v2038_v45, 4 }
  0x72   : > { %v478_v58 = vcombine.high %v470_v55, %v470_v55  ;;  %v487_v59 = vsel %vm486_vm0, %v470_v55, 0.0  ;;  %v472_v61 = vsel %vm2040_vm3, %v464_v53, %v1440_v51  ;;  %v473_v62 = vsel %vm457_vm4, %v465_v54, %v1441_v52 }
  0x73   : > { %v479_v63 = vcombine.high %v471_v57, %v471_v57  ;;  %v488_v1 = vrot.slane %v487_v59, 4  ;;  %v480_v2 = vcombine.high %v472_v61, %v472_v61  ;;  %v481_v4 = vcombine.high %v473_v62, %v473_v62 }
  0x74   : > { %v494_v5 = vsel %vm486_vm0, %v478_v58, 0.0  ;;  %v501_v6 = vsel %vm486_vm0, %v471_v57, 0.0  ;;  %v515_v12 = vsel %vm486_vm0, %v472_v61, 0.0  ;;  %v529_v17 = vsel %vm486_vm0, %v473_v62, 0.0  ;;  %v2061_v62 = vld [vmem:[%s1966_s23 + $0x10] sm:$0xff] }
  0x75   : > { %v489_v7 = vadd.f32 %v488_v1, %v487_v59  ;;  %v495_v8 = vrot.slane %v494_v5, 4  ;;  %v502_v9 = vrot.slane %v501_v6, 4  ;;  %v508_v10 = vsel %vm486_vm0, %v479_v63, 0.0  ;;  %v2064_v63 = vld [vmem:[%s1966_s23 + $0x50] sm:$0xff] }
  0x76   : > { %v509_v11 = vrot.slane %v508_v10, 4  ;;  %v522_v16 = vsel %vm486_vm0, %v480_v2, 0.0  ;;  %v516_v24 = vrot.slane %v515_v12, 4  ;;  %v530_v30 = vrot.slane %v529_v17, 4 }
  0x77   : > { %v490_v18 = vrot.slane %v489_v7, 2  ;;  %v496_v19 = vadd.f32 %v495_v8, %v494_v5  ;;  %v503_v20 = vadd.f32 %v502_v9, %v501_v6  ;;  %v523_v29 = vrot.slane %v522_v16, 4  ;;  %v2067_v6 = vld [vmem:[%s1966_s23 + $0x18] sm:$0xff] }
  0x78   : > { %v510_v25 = vadd.f32 %v509_v11, %v508_v10  ;;  %v536_v35 = vsel %vm486_vm0, %v481_v4, 0.0  ;;  %v517_v41 = vadd.f32 %v516_v24, %v515_v12  ;;  %v531_v46 = vadd.f32 %v530_v30, %v529_v17  ;;  %v2078_v12 = vld [vmem:[%s1966_s23 + $0x20] sm:$0xff]  ;;  %v2095_v30 = vld [vmem:[%s1966_s23 + $0x70] sm:$0xff] }
  0x79   : > { %v491_v36 = vadd.f32 %v490_v18, %v489_v7  ;;  %v497_v39 = vrot.slane %v496_v19, 2  ;;  %v504_v40 = vrot.slane %v503_v20, 2  ;;  %v524_v44 = vadd.f32 %v523_v29, %v522_v16  ;;  %v2070_v7 = vld [vmem:[%s1966_s23 + $0x58] sm:$0xff]  ;;  %v2081_v16 = vld [vmem:[%s1966_s23 + $0x28] sm:$0xff]  ;;  %v2084_v17 = vld [vmem:[%s1966_s23 + $0x60] sm:$0xff] }
  0x7a   : > { %v511_v43 = vrot.slane %v510_v25, 2  ;;  %v537_v47 = vrot.slane %v536_v35, 4  ;;  %v518_v51 = vrot.slane %v517_v41, 2  ;;  %v532_v54 = vrot.slane %v531_v46, 2  ;;  %v2092_v29 = vld [vmem:[%s1966_s23 + $0x68] sm:$0xff] }
  0x7b   : > { %v492_v48 = vrot.slane %v491_v36, 1  ;;  %v498_v49 = vadd.f32 %v497_v39, %v496_v19  ;;  %v505_v50 = vadd.f32 %v504_v40, %v503_v20  ;;  %v525_v53 = vrot.slane %v524_v44, 2 }
  0x7c   : > { %v512_v52 = vadd.f32 %v511_v43, %v510_v25  ;;  %v538_v55 = vadd.f32 %v537_v47, %v536_v35  ;;  %v519_v61 = vadd.f32 %v518_v51, %v517_v41  ;;  %v533_v4 = vadd.f32 %v532_v54, %v531_v46  ;;  %v2089_v25 = vld [vmem:[%s1966_s23 + $0x30] sm:$0xff]  ;;  %v2114_v46 = vld [vmem:[%s1966_s23 + $0x78] sm:$0xff] }
  0x7d   : > { %v2058_v57 = vadd.f32 %v492_v48, %v491_v36  ;;  %v499_v58 = vrot.slane %v498_v49, 1  ;;  %v506_v59 = vrot.slane %v505_v50, 1  ;;  %v526_v2 = vadd.f32 %v525_v53, %v524_v44  ;;  %v2111_v44 = vld [vmem:[%s1966_s23 + $0x38] sm:$0xff] }
  0x7e   : > { %v513_v1 = vrot.slane %v512_v52, 1  ;;  %v539_v5 = vrot.slane %v538_v55, 2  ;;  %v520_v10 = vrot.slane %v519_v61, 1  ;;  %v545_v11 = vmax.f32 %v2034_v42, %v544_v56 }
  0x7f   : > { %v2072_v8 = vadd.f32 %v499_v58, %v498_v49  ;;  %v2074_v9 = vadd.f32 %v506_v59, %v505_v50  ;;  %v527_v19 = vrot.slane %v526_v2, 1  ;;  %v534_v20 = vrot.slane %v533_v4, 1 }
  0x80   : > { %v2086_v18 = vadd.f32 %v513_v1, %v512_v52  ;;  %v540_v24 = vadd.f32 %v539_v5, %v538_v55  ;;  %v2097_v42 = vadd.f32 %v520_v10, %v519_v61  ;;  %v546_v56 = vrot.slane %v545_v11, 2 }
  0x81   : > { %v552_v35 = vmax.f32 %v2038_v45, %v551_v60  ;;  %v557_v36 = vmax.f32 %v2061_v62, %v2064_v63  ;;  %v2104_v39 = vadd.f32 %v527_v19, %v526_v2  ;;  %v2106_v40 = vadd.f32 %v534_v20, %v533_v4 }
  0x82   : > { %v541_v41 = vrot.slane %v540_v24, 1  ;;  %v564_v43 = vmax.f32 %v2067_v6, %v2070_v7  ;;  %v547_v47 = vmax.f32 %v545_v11, %v546_v56  ;;  %v571_v45 = vmax.f32 %v2078_v12, %v2084_v17 }
  0x83   : > { %v553_v48 = vrot.slane %v552_v35, 2  ;;  %v558_v49 = vrot.slane %v557_v36, 4  ;;  %v578_v51 = vmax.f32 %v2081_v16, %v2092_v29  ;;  %v585_v52 = vmax.f32 %v2089_v25, %v2095_v30 }
  0x84   : > { %v2118_v60 = vadd.f32 %v541_v41, %v540_v24  ;;  %v565_v50 = vrot.slane %v564_v43, 4  ;;  %v548_v53 = vrot.slane %v547_v47, 1  ;;  %v572_v58 = vrot.slane %v571_v45, 4 }
  0x85   : > { %v554_v54 = vmax.f32 %v552_v35, %v553_v48  ;;  %v559_v55 = vmax.f32 %v557_v36, %v558_v49  ;;  %v579_v61 = vrot.slane %v578_v51, 4  ;;  %v586_v1 = vrot.slane %v585_v52, 4 }
  0x86   : > { %v566_v59 = vmax.f32 %v564_v43, %v565_v50  ;;  %v592_v2 = vmax.f32 %v2111_v44, %v2114_v46  ;;  %v2126_v4 = vmax.f32 %v547_v47, %v548_v53  ;;  %v573_v11 = vmax.f32 %v571_v45, %v572_v58 }
  0x87   : > { %v555_v5 = vrot.slane %v554_v54, 1  ;;  %v560_v10 = vrot.slane %v559_v55, 2  ;;  %v580_v20 = vmax.f32 %v578_v51, %v579_v61  ;;  %v587_v24 = vmax.f32 %v585_v52, %v586_v1 }
  0x88   : > { %2507 = vst [vmem:[#allocation20_spill] sm:$0xff] %v2126_v4  ;;  %v567_v19 = vrot.slane %v566_v59, 2  ;;  %v593_v56 = vrot.slane %v592_v2, 4  ;;  %v574_v36 = vrot.slane %v573_v11, 2  ;;  %v599_v43 = vsub.f32 %v1999_v23, %v2126_v4 }
  0x89   : > { %v2128_v41 = vmax.f32 %v554_v54, %v555_v5  ;;  %v561_v35 = vmax.f32 %v559_v55, %v560_v10  ;;  %v581_v49 = vrot.slane %v580_v20, 2  ;;  %v588_v50 = vrot.slane %v587_v24, 2 }
  0x8a   : > { %v568_v48 = vmax.f32 %v566_v59, %v567_v19  ;;  %v594_v0 = vmax.f32 %v592_v2, %v593_v56  ;;  %v575_v53 = vmax.f32 %v573_v11, %v574_v36  ;;  %v607_v51 = vsub.f32 %v2017_v33, %v2126_v4 }
  0x8b   : > { %2508 = vst [vmem:[#allocation21_spill] sm:$0xff] %v2128_v41  ;;  %v562_v47 = vrot.slane %v561_v35, 1  ;;  %v600_v45 = vsub.f32 %v2008_v28, %v2128_v41  ;;  %v582_v54 = vmax.f32 %v580_v20, %v581_v49  ;;  %v589_v58 = vmax.f32 %v587_v24, %v588_v50 }
  0x8c   : > { %v569_v52 = vrot.slane %v568_v48, 1  ;;  %v595_v55 = vrot.slane %v594_v0, 2  ;;  %v576_v1 = vrot.slane %v575_v53, 1  ;;  %v608_v59 = vsub.f32 %v2020_v34, %v2128_v41 }
  0x8d   : > { %v2136_v61 = vmax.f32 %v561_v35, %v562_v47  ;;  %v615_v5 = vmul.f32 1.442695, %v599_v43  ;;  %v583_v10 = vrot.slane %v582_v54, 1  ;;  %v590_v11 = vrot.slane %v589_v58, 1 }
  0x8e   : > { %v2140_v2 = vmax.f32 %v568_v48, %v569_v52  ;;  %v596_v19 = vmax.f32 %v594_v0, %v595_v55  ;;  %v2142_v56 = vmax.f32 %v575_v53, %v576_v1  ;;  %v617_v47 = vmul.f32 1.442695, %v600_v45 }
  0x8f   : > { %2509 = vst [vmem:[#allocation22_spill] sm:$0xff] %v2136_v61  ;;  %v601_v36 = vsub.f32 %v2061_v62, %v2136_v61  ;;  %v609_v20 = vsub.f32 %v2064_v63, %v2136_v61  ;;  %1535 = vpow2.f32 %v615_v5  ;;  %v2148_v24 = vmax.f32 %v582_v54, %v583_v10  ;;  %v2171_v10 = vld [vmem:[%s1974_s6] sm:$0xff] }
  0x90   : > { %2510 = vst [vmem:[#allocation23_spill] sm:$0xff] %v2140_v2  ;;  %2511 = vst [vmem:[#allocation24_spill] sm:$0xff] %v2142_v56  ;;  %v2150_v35 = vmax.f32 %v589_v58, %v590_v11  ;;  %v597_v43 = vrot.slane %v596_v19, 1  ;;  %v602_v48 = vsub.f32 %v2067_v6, %v2140_v2  ;;  %v603_v0 = vsub.f32 %v2078_v12, %v2142_v56 }
  0x91   : > { %2512 = vst [vmem:[#allocation25_spill] sm:$0xff] %v2148_v24  ;;  %v610_v49 = vsub.f32 %v2070_v7, %v2140_v2  ;;  %v611_v50 = vsub.f32 %v2084_v17, %v2142_v56  ;;  %v604_v52 = vsub.f32 %v2081_v16, %v2148_v24  ;;  %v612_v58 = vsub.f32 %v2092_v29, %v2148_v24 }
  0x92   : > { %2513 = vst [vmem:[#allocation26_spill] sm:$0xff] %v2150_v35  ;;  %v2160_v53 = vmax.f32 %v596_v19, %v597_v43  ;;  %v605_v54 = vsub.f32 %v2089_v25, %v2150_v35  ;;  %v613_v55 = vsub.f32 %v2095_v30, %v2150_v35  ;;  %1537 = vpow2.f32 %v617_v47 }
  0x93   : > { %v619_v1 = vmul.f32 1.442695, %v601_v36  ;;  %v621_v5 = vmul.f32 1.442695, %v602_v48  ;;  %v623_v19 = vmul.f32 1.442695, %v603_v0  ;;  %v725_v4 = vrot.slane %v2171_v10, %v1987_v14 }
  0x94   : > { %v606_v45 = vsub.f32 %v2111_v44, %v2160_v53  ;;  %v614_v11 = vsub.f32 %v2114_v46, %v2160_v53  ;;  %v625_v43 = vmul.f32 1.442695, %v604_v52  ;;  %v627_v38 = vmul.f32 1.442695, %v605_v54 }
  0x95   : > { %1539 = vpow2.f32 %v619_v1  ;;  %v631_v56 = vmul.f32 1.442695, %v607_v51  ;;  %v633_v24 = vmul.f32 1.442695, %v608_v59  ;;  %v635_v35 = vmul.f32 1.442695, %v609_v20 }
  0x96   : > { %1541 = vpow2.f32 %v621_v5  ;;  %v629_v2 = vmul.f32 1.442695, %v606_v45  ;;  %v637_v47 = vmul.f32 1.442695, %v610_v49  ;;  %v639_v36 = vmul.f32 1.442695, %v611_v50 }
  0x97   : > { %1543 = vpow2.f32 %v623_v19  ;;  %v641_v48 = vmul.f32 1.442695, %v612_v58  ;;  %v643_v61 = vmul.f32 1.442695, %v613_v55  ;;  %v645_v41 = vmul.f32 1.442695, %v614_v11 }
  0x98   : > { %1545 = vpow2.f32 %v625_v43  ;;  %v729_v0 = vrot.slane %v2171_v10, %v1990_v15  ;;  %v733_v51 = vrot.slane %v2171_v10, %v1993_v21  ;;  %v737_v59 = vrot.slane %v2171_v10, %v1996_v22 }
  0x99   : > { %1547 = vpow2.f32 %v627_v38  ;;  %v741_v20 = vrot.slane %v2171_v10, %v2002_v26  ;;  %v745_v49 = vrot.slane %v2171_v10, %v2005_v27  ;;  %v749_v50 = vrot.slane %v2171_v10, %v2011_v31 }
  0x9a   : > { %1549 = vpow2.f32 %v629_v2  ;;  %v753_v52 = vrot.slane %v2171_v10, %v2014_v32  ;;  %vm754_vm5 = vcmp.eq.s32.totalorder %v1981_v3, %v725_v4  ;;  %vm755_vm6 = vcmp.eq.s32.totalorder %v1981_v3, %v729_v0 }
  0x9b   : > { %1551 = vpow2.f32 %v631_v56  ;;  %vm756_vm7 = vcmp.eq.s32.totalorder %v1981_v3, %v733_v51  ;;  %vm757_vm8 = vcmp.eq.s32.totalorder %v1981_v3, %v737_v59  ;;  %vm758_vm9 = vcmp.eq.s32.totalorder %v1981_v3, %v741_v20 }
  0x9c   : > { %v1536_v38 = vpop.eup %1535  ;;  %1553 = vpow2.f32 %v633_v24  ;;  %vm759_vm10 = vcmp.eq.s32.totalorder %v1981_v3, %v745_v49  ;;  %vm760_vm11 = vcmp.eq.s32.totalorder %v1981_v3, %v749_v50  ;;  %vm761_vm12 = vcmp.eq.s32.totalorder %v1981_v3, %v753_v52 }
  0x9d   : > { %1555 = vpow2.f32 %v635_v35  ;;  %vm762_vm13 = vcmp.eq.s32.totalorder %v1984_v13, %v725_v4  ;;  %vm763_vm14 = vcmp.eq.s32.totalorder %v1984_v13, %v729_v0  ;;  %vm764_vm15 = vcmp.eq.s32.totalorder %v1984_v13, %v733_v51 }
  0x9e   : > { %1557 = vpow2.f32 %v637_v47  ;;  %vm765_vm0 = vcmp.eq.s32.totalorder %v1984_v13, %v737_v59  ;;  %vm766_vm1 = vcmp.eq.s32.totalorder %v1984_v13, %v741_v20  ;;  %vm767_vm2 = vcmp.eq.s32.totalorder %v1984_v13, %v745_v49 }
  0x9f   : > { %1559 = vpow2.f32 %v639_v36  ;;  %vm768_vm3 = vcmp.eq.s32.totalorder %v1984_v13, %v749_v50  ;;  %v1538_v2 = vpop.eup %1537  ;;  %vm769_vm4 = vcmp.eq.s32.totalorder %v1984_v13, %v753_v52  ;;  %v770_v56 = vsel %vm754_vm5, %v1999_v23, 0.0 }
  0xa0   : > { %1561 = vpow2.f32 %v641_v48  ;;  %v771_v24 = vsel %vm755_vm6, %v2008_v28, 0.0  ;;  %v772_v35 = vsel %vm756_vm7, %v2061_v62, 0.0  ;;  %v773_v54 = vsel %vm757_vm8, %v2067_v6, 0.0 }
  0xa1   : > { %1563 = vpow2.f32 %v643_v61  ;;  %v774_v58 = vsel %vm758_vm9, %v2078_v12, 0.0  ;;  %v775_v23 = vsel %vm759_vm10, %v2081_v16, 0.0  ;;  %v776_v28 = vsel %vm760_vm11, %v2089_v25, 0.0 }
  0xa2   : > { %v1540_v55 = vpop.eup %1539  ;;  %1565 = vpow2.f32 %v645_v41  ;;  %v777_v62 = vsel %vm761_vm12, %v2111_v44, 0.0  ;;  %v778_v6 = vsel %vm762_vm13, %v2017_v33, 0.0  ;;  %v779_v12 = vsel %vm763_vm14, %v2020_v34, 0.0 }
  0xa3   : > { %v1542_v61 = vpop.eup %1541  ;;  %v780_v16 = vsel %vm764_vm15, %v2064_v63, 0.0  ;;  %v781_v25 = vsel %vm765_vm0, %v2070_v7, 0.0  ;;  %v782_v44 = vsel %vm766_vm1, %v2084_v17, 0.0  ;;  %v783_v33 = vsel %vm767_vm2, %v2092_v29, 0.0 }
  0xa4   : > { %v1544_v41 = vpop.eup %1543  ;;  %v784_v34 = vsel %vm768_vm3, %v2095_v30, 0.0  ;;  %v785_v63 = vsel %vm769_vm4, %v2114_v46, 0.0  ;;  %v786_v1 = vadd.f32 %v778_v6, %v770_v56  ;;  %v793_v7 = vadd.f32 %v779_v12, %v771_v24 }
  0xa5   : > { %v1546_v4 = vpop.eup %1545  ;;  %v800_v5 = vadd.f32 %v780_v16, %v772_v35  ;;  %v807_v45 = vadd.f32 %v781_v25, %v773_v54  ;;  %v814_v19 = vadd.f32 %v782_v44, %v774_v58  ;;  %v821_v17 = vadd.f32 %v783_v33, %v775_v23 }
  0xa6   : > { %v1548_v11 = vpop.eup %1547  ;;  %v2257_v43 = vadd.f32 %v784_v34, %v776_v28  ;;  %v2259_v47 = vadd.f32 %v785_v63, %v777_v62  ;;  %v787_v36 = vrot.slane %v786_v1, 4  ;;  %v794_v48 = vrot.slane %v793_v7, 4 }
  0xa7   : > { %v1550_v29 = vpop.eup %1549  ;;  %v801_v30 = vrot.slane %v800_v5, 4  ;;  %v808_v0 = vrot.slane %v807_v45, 4  ;;  %v815_v13 = vrot.slane %v814_v19, 4  ;;  %v822_v46 = vrot.slane %v821_v17, 4 }
  0xa8   : > { %v1552_v51 = vpop.eup %1551  ;;  %v788_v52 = vadd.f32 %v787_v36, %v786_v1  ;;  %v795_v56 = vadd.f32 %v794_v48, %v793_v7  ;;  %vm858_vm5 = vcmp.gt.s32.totalorder %v2171_v10, 0  ;;  %vm970_vm6 = vcmp.eq.s32.totalorder %v1981_v3, 0 }
  0xa9   : > { %v1554_v49 = vpop.eup %1553  ;;  %v647_v50 = vadd.f32 %v1552_v51, %v1536_v38  ;;  %v2263_v24 = vadd.f32 %v801_v30, %v800_v5  ;;  %v2265_v58 = vadd.f32 %v808_v0, %v807_v45  ;;  %v2267_v23 = vadd.f32 %v815_v13, %v814_v19 }
  0xaa   : > { %v1556_v35 = vpop.eup %1555  ;;  %v654_v54 = vadd.f32 %v1554_v49, %v1538_v2  ;;  %v2269_v28 = vadd.f32 %v822_v46, %v821_v17  ;;  %v789_v16 = vrot.slane %v788_v52, 2  ;;  %v796_v25 = vrot.slane %v795_v56, 2 }
  0xab   : > { %v1558_v62 = vpop.eup %1557  ;;  %v648_v6 = vrot.slane %v647_v50, 4  ;;  %v661_v12 = vadd.f32 %v1556_v35, %v1540_v55  ;;  %v803_v34 = vrot.slane %v2263_v24, 2  ;;  %v810_v63 = vrot.slane %v2265_v58, 2 }
  0xac   : > { %v1560_v44 = vpop.eup %1559  ;;  %v655_v33 = vrot.slane %v654_v54, 4  ;;  %v668_v38 = vadd.f32 %v1558_v62, %v1542_v61  ;;  %v790_v45 = vadd.f32 %v789_v16, %v788_v52  ;;  %v797_v30 = vadd.f32 %v796_v25, %v795_v56 }
  0xad   : > { %v1562_v1 = vpop.eup %1561  ;;  %v649_v2 = vadd.f32 %v648_v6, %v647_v50  ;;  %v662_v7 = vrot.slane %v661_v12, 4  ;;  %v675_v5 = vadd.f32 %v1560_v44, %v1544_v41  ;;  %vm1147_vm7 = vcmask 1040384  }
  0xae   : > { %v1564_v19 = vpop.eup %1563  ;;  %v656_v17 = vadd.f32 %v655_v33, %v654_v54  ;;  %v669_v36 = vrot.slane %v668_v38, 4  ;;  %v682_v48 = vadd.f32 %v1562_v1, %v1546_v4 }
  0xaf   : > { %v1566_v55 = vpop.eup %1565  ;;  %v650_v0 = vrot.slane %v649_v2, 2  ;;  %v663_v51 = vadd.f32 %v662_v7, %v661_v12  ;;  %v676_v13 = vrot.slane %v675_v5, 4  ;;  %v689_v46 = vadd.f32 %v1564_v19, %v1548_v11 }
  0xb0   : > { %v657_v61 = vrot.slane %v656_v17, 2  ;;  %v670_v49 = vadd.f32 %v669_v36, %v668_v38  ;;  %v683_v35 = vrot.slane %v682_v48, 4  ;;  %v696_v62 = vadd.f32 %v1566_v55, %v1550_v29 }
  0xb1   : > { %v651_v20 = vadd.f32 %v650_v0, %v649_v2  ;;  %v664_v59 = vrot.slane %v663_v51, 2  ;;  %v677_v50 = vadd.f32 %v676_v13, %v675_v5  ;;  %v690_v6 = vrot.slane %v689_v46, 4 }
  0xb2   : > { %v658_v41 = vadd.f32 %v657_v61, %v656_v17  ;;  %v671_v52 = vrot.slane %v670_v49, 2  ;;  %v684_v16 = vadd.f32 %v683_v35, %v682_v48  ;;  %v697_v54 = vrot.slane %v696_v62, 4 }
  0xb3   : > { %v652_v44 = vrot.slane %v651_v20, 1  ;;  %v665_v4 = vadd.f32 %v664_v59, %v663_v51  ;;  %v678_v56 = vrot.slane %v677_v50, 2  ;;  %v691_v25 = vadd.f32 %v690_v6, %v689_v46 }
  0xb4   : > { %v659_v33 = vrot.slane %v658_v41, 1  ;;  %v672_v12 = vadd.f32 %v671_v52, %v670_v49  ;;  %v685_v1 = vrot.slane %v684_v16, 2  ;;  %v698_v11 = vadd.f32 %v697_v54, %v696_v62 }
  0xb5   : > { %v653_v7 = vadd.f32 %v652_v44, %v651_v20  ;;  %v666_v38 = vrot.slane %v665_v4, 1  ;;  %v679_v19 = vadd.f32 %v678_v56, %v677_v50  ;;  %v692_v29 = vrot.slane %v691_v25, 2 }
  0xb6   : > { %v660_v2 = vadd.f32 %v659_v33, %v658_v41  ;;  %v673_v36 = vrot.slane %v672_v12, 1  ;;  %v686_v5 = vadd.f32 %v685_v1, %v684_v16  ;;  %v699_v55 = vrot.slane %v698_v11, 2 }
  0xb7   : > { %v667_v17 = vadd.f32 %v666_v38, %v665_v4  ;;  %v680_v0 = vrot.slane %v679_v19, 1  ;;  %v693_v48 = vadd.f32 %v692_v29, %v691_v25  ;;  %1567 = vlog2.f32 %v653_v7 }
  0xb8   : > { %v674_v13 = vadd.f32 %v673_v36, %v672_v12  ;;  %v687_v59 = vrot.slane %v686_v5, 1  ;;  %v700_v51 = vadd.f32 %v699_v55, %v698_v11  ;;  %1569 = vlog2.f32 %v660_v2 }
  0xb9   : > { %v681_v46 = vadd.f32 %v680_v0, %v679_v19  ;;  %v694_v61 = vrot.slane %v693_v48, 1  ;;  %1571 = vlog2.f32 %v667_v17  ;;  %v791_v49 = vrot.slane %v790_v45, 1 }
  0xba   : > { %v688_v20 = vadd.f32 %v687_v59, %v686_v5  ;;  %v701_v35 = vrot.slane %v700_v51, 1  ;;  %1573 = vlog2.f32 %v674_v13  ;;  %v798_v62 = vrot.slane %v797_v30, 1 }
  0xbb   : > { %v695_v50 = vadd.f32 %v694_v61, %v693_v48  ;;  %1575 = vlog2.f32 %v681_v46  ;;  %v2273_v6 = vadd.f32 %v791_v49, %v790_v45  ;;  %v804_v41 = vadd.f32 %v803_v34, %v2263_v24 }
  0xbc   : > { %v702_v52 = vadd.f32 %v701_v35, %v700_v51  ;;  %1577 = vlog2.f32 %v688_v20  ;;  %v2278_v16 = vadd.f32 %v798_v62, %v797_v30  ;;  %v811_v54 = vadd.f32 %v810_v63, %v2265_v58  ;;  %v2516_v62 = vld [vmem:[#allocation20_spill] sm:$0xff] }
  0xbd   : > { %1579 = vlog2.f32 %v695_v50  ;;  %v805_v44 = vrot.slane %v804_v41, 1  ;;  %v817_v4 = vrot.slane %v2267_v23, 2  ;;  %v824_v56 = vrot.slane %v2269_v28, 2 }
  0xbe   : > { %1581 = vlog2.f32 %v702_v52  ;;  %v812_v45 = vrot.slane %v811_v54, 1  ;;  %v2514_v25 = vrot.slane %v2257_v43, 4  ;;  %v2515_v34 = vrot.slane %v2259_v47, 4 }
  0xbf   : > { %v2291_v33 = vadd.f32 %v805_v44, %v804_v41  ;;  %v818_v58 = vadd.f32 %v817_v4, %v2267_v23  ;;  %v825_v63 = vadd.f32 %v824_v56, %v2269_v28  ;;  %v1793_v7 = vmov 0.0   ;;  %v2517_v4 = vld [vmem:[#allocation21_spill] sm:$0xff] }
  0xc0   : > { %v830_v24 = vadd.f32 %v2514_v25, %v2257_v43  ;;  %v837_v30 = vadd.f32 %v2515_v34, %v2259_v47  ;;  %v2296_v12 = vadd.f32 %v812_v45, %v811_v54  ;;  %v2300_v43 = vsel %vm858_vm5, 1.0, %v1793_v7 }
  0xc1   : > { %v819_v38 = vrot.slane %v818_v58, 1  ;;  %v826_v19 = vrot.slane %v825_v63, 1  ;;  %v868_v47 = vcombine.low %v2058_v57, %v2072_v8  ;;  %v869_v23 = vcombine.low %v2074_v9, %v2086_v18 }
  0xc2   : > { %v831_v1 = vrot.slane %v830_v24, 2  ;;  %v838_v11 = vrot.slane %v837_v30, 2  ;;  %v870_v2 = vcombine.low %v2097_v42, %v2104_v39  ;;  %v871_v36 = vcombine.low %v2106_v40, %v2118_v60 }
  0xc3   : > { %v2310_v5 = vadd.f32 %v819_v38, %v818_v58  ;;  %v2312_v55 = vadd.f32 %v826_v19, %v825_v63  ;;  %v878_v17 = vrot.slane %v868_v47, %v2023_v37  ;;  %v885_v0 = vrot.slane %v869_v23, %v2023_v37  ;;  %v2519_v38 = vld [vmem:[#allocation23_spill] sm:$0xff] }
  0xc4   : > { %v832_v28 = vadd.f32 %v831_v1, %v830_v24  ;;  %v839_v29 = vadd.f32 %v838_v11, %v837_v30  ;;  %v1568_v57 = vpop.eup %1567  ;;  %v892_v9 = vrot.slane %v870_v2, %v2023_v37  ;;  %v899_v18 = vrot.slane %v871_v36, %v2023_v37  ;;  %v2518_v30 = vld [vmem:[#allocation22_spill] sm:$0xff] }
  0xc5   : > { %v1570_v13 = vpop.eup %1569  ;;  %v704_v42 = vmul.f32 0.6931472, %v1568_v57  ;;  %v900_v39 = vcombine.low %v878_v17, %v885_v0  ;;  %v1007_v40 = vrot.slane %v2300_v43, %v1987_v14  ;;  %v1011_v60 = vrot.slane %v2300_v43, %v1990_v15  ;;  %v2521_v0 = vld [vmem:[#allocation25_spill] sm:$0xff] }
  0xc6   : > { %v833_v8 = vrot.slane %v832_v28, 1  ;;  %v840_v48 = vrot.slane %v839_v29, 1  ;;  %v1572_v59 = vpop.eup %1571  ;;  %v706_v51 = vmul.f32 0.6931472, %v1570_v13  ;;  %v901_v49 = vcombine.low %v892_v9, %v899_v18 }
  0xc7   : > { %v1574_v20 = vpop.eup %1573  ;;  %v708_v35 = vmul.f32 0.6931472, %v1572_v59  ;;  %v842_v50 = vadd.f32 %v704_v42, %v2516_v62  ;;  %v908_v41 = vrot.slane %v900_v39, %v2023_v37  ;;  %v1015_v52 = vrot.slane %v2300_v43, %v1993_v21 }
  0xc8   : > { %v834_v46 = vadd.f32 %v833_v8, %v832_v28  ;;  %v841_v61 = vadd.f32 %v840_v48, %v839_v29  ;;  %v1576_v54 = vpop.eup %1575  ;;  %v710_v44 = vmul.f32 0.6931472, %v1574_v20  ;;  %v843_v56 = vadd.f32 %v706_v51, %v2517_v4  ;;  %v2520_v29 = vld [vmem:[#allocation24_spill] sm:$0xff]  ;;  %v2522_v48 = vld [vmem:[#allocation26_spill] sm:$0xff] }
  0xc9   : > { %v915_v45 = vrot.slane %v901_v49, %v2023_v37  ;;  %v1019_v25 = vrot.slane %v2300_v43, %v1996_v22  ;;  %v1578_v24 = vpop.eup %1577  ;;  %v712_v34 = vmul.f32 0.6931472, %v1576_v54  ;;  %v844_v58 = vadd.f32 %v708_v35, %v2518_v30 }
  0xca   : > { %v850_v63 = vsub.f32 %v842_v50, %v2273_v6  ;;  %v1023_v1 = vrot.slane %v2300_v43, %v2002_v26  ;;  %v1580_v11 = vpop.eup %1579  ;;  %v714_v7 = vmul.f32 0.6931472, %v1578_v24  ;;  %v845_v19 = vadd.f32 %v710_v44, %v2519_v38 }
  0xcb   : > { %v851_v47 = vsub.f32 %v843_v56, %v2278_v16  ;;  %v916_v23 = vcombine.low %v908_v41, %v915_v45  ;;  %v1582_v37 = vpop.eup %1581  ;;  %v716_v28 = vmul.f32 0.6931472, %v1580_v11  ;;  %v846_v2 = vadd.f32 %v712_v34, %v2520_v29 }
  0xcc   : > { %v852_v36 = vsub.f32 %v844_v58, %v2291_v33  ;;  %v1027_v6 = vrot.slane %v2300_v43, %v2005_v27  ;;  %v718_v17 = vmul.f32 0.6931472, %v1582_v37  ;;  %v847_v57 = vadd.f32 %v714_v7, %v2521_v0 }
  0xcd   : > { %v853_v8 = vsub.f32 %v845_v19, %v2296_v12  ;;  %v918_v16 = vsel %vm858_vm5, %v916_v23, 0.0  ;;  %v848_v9 = vadd.f32 %v716_v28, %v2522_v48  ;;  %v854_v18 = vsub.f32 %v846_v2, %v2310_v5 }
  0xce   : > { %v923_v13 = vrot.slane %v918_v16, %v1987_v14  ;;  %v927_v42 = vrot.slane %v918_v16, %v1990_v15  ;;  %v849_v33 = vadd.f32 %v718_v17, %v2160_v53  ;;  %v855_v39 = vsub.f32 %v847_v57, %v2312_v55 }
  0xcf   : > { %v931_v59 = vrot.slane %v918_v16, %v1993_v21  ;;  %v935_v51 = vrot.slane %v918_v16, %v1996_v22  ;;  %v856_v12 = vsub.f32 %v848_v9, %v834_v46  ;;  %v939_v10 = vrot.slane %v918_v16, %v2002_v26 }
  0xd0   : > { %v943_v49 = vrot.slane %v918_v16, %v2005_v27  ;;  %v947_v20 = vrot.slane %v918_v16, %v2011_v31  ;;  %v857_v5 = vsub.f32 %v849_v33, %v841_v61  ;;  %v951_v35 = vrot.slane %v918_v16, %v2014_v32 }
  0xd1   : > { %v960_v62 = vadd.f32 %v923_v13, %v850_v63  ;;  %v961_v50 = vadd.f32 %v927_v42, %v851_v47  ;;  %v962_v41 = vadd.f32 %v931_v59, %v852_v36  ;;  %v963_v53 = vadd.f32 %v935_v51, %v853_v8 }
  0xd2   : > { %v964_v54 = vadd.f32 %v939_v10, %v854_v18  ;;  %v965_v55 = vadd.f32 %v943_v49, %v855_v39  ;;  %v966_v44 = vadd.f32 %v947_v20, %v856_v12  ;;  %v967_v4 = vadd.f32 %v951_v35, %v857_v5 }
  0xd3   : > { %v974_v56 = vrot.slane %v960_v62, %v1987_v14  ;;  %v978_v46 = vrot.slane %v961_v50, %v1987_v14  ;;  %v982_v45 = vrot.slane %v962_v41, %v1987_v14  ;;  %v986_v24 = vrot.slane %v963_v53, %v1987_v14 }
  0xd4   : > { %v990_v61 = vrot.slane %v964_v54, %v1987_v14  ;;  %v994_v34 = vrot.slane %v965_v55, %v1987_v14  ;;  %v998_v30 = vrot.slane %v966_v44, %v1987_v14  ;;  %v1002_v58 = vrot.slane %v967_v4, %v1987_v14 }
  0xd5   : > { %v1031_v63 = vrot.slane %v2300_v43, %v2011_v31  ;;  %v1035_v11 = vrot.slane %v2300_v43, %v2014_v32  ;;  %v1044_v7 = vsel %vm970_vm6, %v974_v56, %v1007_v40  ;;  %v1045_v38 = vsel %vm970_vm6, %v978_v46, %v1011_v60 }
  0xd6   : > { %v1046_v19 = vsel %vm970_vm6, %v982_v45, %v1015_v52  ;;  %v1047_v47 = vsel %vm970_vm6, %v986_v24, %v1019_v25  ;;  %v1048_v23 = vsel %vm970_vm6, %v990_v61, %v1023_v1  ;;  %v1049_v37 = vsel %vm970_vm6, %v994_v34, %v1027_v6  ;;  %v2523_v52 = vld [vmem:[#allocation19_spill] sm:$0xff] }
  0xd7   : > { %v1050_v40 = vsel %vm970_vm6, %v998_v30, %v1031_v63  ;;  %v1051_v43 = vsel %vm970_vm6, %v1002_v58, %v1035_v11  ;;  %v1060_v28 = vcombine.low %v1044_v7, %v1045_v38  ;;  %v1061_v60 = vcombine.low %v1046_v19, %v1047_v47 }
  0xd8   : > { %v1077_v29 = vcombine.low %v1048_v23, %v1049_v37  ;;  %v1078_v2 = vcombine.low %v1050_v40, %v1051_v43 }
  0xd9   : > { %v1068_v36 = vrot.slane %v1060_v28, %v2523_v52  ;;  %v1075_v25 = vrot.slane %v1061_v60, %v2523_v52 }
  0xda   : > { %v1085_v17 = vrot.slane %v1077_v29, %v2523_v52  ;;  %v1092_v1 = vrot.slane %v1078_v2, %v2523_v52 }
  0xdb   : > { %v1076_v0 = vcombine.low %v1068_v36, %v1075_v25 }
  0xdc   : > { %v1093_v6 = vcombine.low %v1085_v17, %v1092_v1  ;;  %v2524_v17 = vlaneseq }
  0xdd   : > { %v1110_v57 = vrot.slane %v1076_v0, %v1987_v14  ;;  %v1114_v3 = vrot.slane %v1076_v0, %v1993_v21  ;;  %v1118_v8 = vrot.slane %v1076_v0, %v2002_v26  ;;  %v1122_v16 = vrot.slane %v1076_v0, %v2011_v31 }
  0xde   : > { %v1126_v48 = vrot.slane %v1093_v6, %v1987_v14  ;;  %v1130_v42 = vrot.slane %v1093_v6, %v1993_v21  ;;  %v1175_v59 = vrot.slane %v1076_v0, %v1990_v15  ;;  %v1179_v51 = vrot.slane %v1076_v0, %v1996_v22 }
  0xdf   : > { %v1148_v9 = vsel %vm1147_vm7, %v1110_v57, 0.0  ;;  %v1149_v18 = vsel %vm1147_vm7, %v1114_v3, 0.0  ;;  %v1151_v13 = vsel %vm1147_vm7, %v1118_v8, 0.0  ;;  %v1153_v39 = vsel %vm1147_vm7, %v1122_v16, 0.0 }
  0xe0   : > { %v1150_v33 = vadd.f32 %v1149_v18, %v1148_v9  ;;  %v1183_v12 = vrot.slane %v1076_v0, %v2005_v27  ;;  %v1134_v10 = vrot.slane %v1093_v6, %v2002_v26  ;;  %v1187_v49 = vrot.slane %v1076_v0, %v2014_v32 }
  0xe1   : > { %v1155_v20 = vsel %vm1147_vm7, %v1126_v48, 0.0  ;;  %v1191_v5 = vrot.slane %v1093_v6, %v1990_v15  ;;  %v1212_v21 = vsel %vm1147_vm7, %v1175_v59, 0.0  ;;  %v1213_v35 = vsel %vm1147_vm7, %v1179_v51, 0.0 }
  0xe2   : > { %v1152_v14 = vadd.f32 %v1151_v13, %v1150_v33  ;;  %v1214_v50 = vadd.f32 %v1213_v35, %v1212_v21  ;;  %v1215_v41 = vsel %vm1147_vm7, %v1183_v12, 0.0  ;;  %v1138_v53 = vrot.slane %v1093_v6, %v2011_v31 }
  0xe3   : > { %v1157_v54 = vsel %vm1147_vm7, %v1130_v42, 0.0  ;;  %v1195_v26 = vrot.slane %v1093_v6, %v1996_v22  ;;  %v1217_v55 = vsel %vm1147_vm7, %v1187_v49, 0.0  ;;  %v1159_v15 = vsel %vm1147_vm7, %v1134_v10, 0.0 }
  0xe4   : > { %v1154_v62 = vadd.f32 %v1153_v39, %v1152_v14  ;;  %v1216_v4 = vadd.f32 %v1215_v41, %v1214_v50  ;;  %v1199_v56 = vrot.slane %v1093_v6, %v2005_v27  ;;  %v1219_v46 = vsel %vm1147_vm7, %v1191_v5, 0.0 }
  0xe5   : > { %v1161_v61 = vsel %vm1147_vm7, %v1138_v53, 0.0  ;;  %v1203_v31 = vrot.slane %v1093_v6, %v2014_v32  ;;  %v1221_v34 = vsel %vm1147_vm7, %v1195_v26, 0.0  ;;  %v1237_v1 = vand.u32 127, %v2524_v17 }
  0xe6   : > { %v1156_v44 = vadd.f32 %v1155_v20, %v1154_v62  ;;  %v1218_v24 = vadd.f32 %v1217_v55, %v1216_v4  ;;  %v1223_v58 = vsel %vm1147_vm7, %v1199_v56, 0.0 }
  0xe7   : > { %v1225_v7 = vsel %vm1147_vm7, %v1203_v31, 0.0  ;;  %vm1239_vm8 = vcmp.eq.s32.totalorder %v1237_v1, 1  ;;  %vm1238_vm9 = vcmp.eq.s32.totalorder %v1237_v1, 0 }
  0xe8   : > { %v1158_v45 = vadd.f32 %v1157_v54, %v1156_v44  ;;  %v1220_v22 = vadd.f32 %v1219_v46, %v1218_v24 }
  0xea   : > { %v1160_v30 = vadd.f32 %v1159_v15, %v1158_v45  ;;  %v1222_v11 = vadd.f32 %v1221_v34, %v1220_v22 }
  0xec   : > { %v1162_v63 = vadd.f32 %v1161_v61, %v1160_v30  ;;  %v1224_v27 = vadd.f32 %v1223_v58, %v1222_v11 }
  0xee   : > { %1163 = vadd.xlane.f32.xlu0 %v1162_v63  ;;  %v1226_v38 = vadd.f32 %v1225_v7, %v1224_v27 }
  0xf2   : > { %1227 = vadd.xlane.f32.xlu0 %v1226_v38 }
 0x177   : > { %v1164_v19 = vpop.xlane.xlu0 %1163 }
 0x178   : > { %v1165_v47 = vrot.slane %v1164_v19, 4 }
 0x17a   : > { %v1166_v23 = vadd.f32 %v1165_v47, %v1164_v19 }
 0x17b   : > { %v1228_v37 = vpop.xlane.xlu0 %1227 }
 0x17c   : > { %v1167_v32 = vrot.slane %v1166_v23, 2  ;;  %v1229_v40 = vrot.slane %v1228_v37, 4 }
 0x17e   : > { %v1230_v43 = vadd.f32 %v1229_v40, %v1228_v37  ;;  %v1168_v28 = vadd.f32 %v1167_v32, %v1166_v23 }
 0x180   : > { %v1231_v60 = vrot.slane %v1230_v43, 2  ;;  %v1169_v29 = vrot.slane %v1168_v28, 1 }
 0x182   : > { %v1232_v2 = vadd.f32 %v1231_v60, %v1230_v43  ;;  %v1170_v52 = vadd.f32 %v1169_v29, %v1168_v28 }
 0x184   : > { %1449 = vpush %v1170_v52  ;;  %v1233_v36 = vrot.slane %v1232_v2, 1 }
 0x186   : > { %v1234_v25 = vadd.f32 %v1233_v36, %v1232_v2 }
 0x188   : > { %1451 = vpush %v1234_v25 }
 0x1b5   : > { %s1450_s27 = spop %1449 }
 0x1b6   : > { %v1242_v6 = vstv %s1450_s27 }
 0x1b9   : > { %s1452_s13 = spop %1451 }
 0x1ba   : > { %v1240_v0 = vstv %s1452_s13 }
 0x1bb   : > { %v1241_v57 = vsel %vm1239_vm8, %v1240_v0, 0.0 }
 0x1bc   : > { %v1243_v3 = vsel %vm1238_vm9, %v1242_v6, %v1241_v57 }
 0x1bd   : > { %1244 = vst [vmem:[%s398_s11] sm:$0x1] %v1243_v3 }
 0x1be   : > { %1708 = shalt.err (!%p1705_p2)
}
 0x1bf   : > { %s1709_s9 = scalar_lea.hbm %s2433_s7, 16  ;;  %s1713_s23 = scalar_lea.hbm %s2479_s4, 32 }
 0x1c0   : > { %p1710_p4 = scmp.ne.s32.totalorder %s2433_s7, %s1709_s9  ;;  %p1714_p7 = scmp.lt.s32.totalorder %s2433_s7, %s2479_s4 }
 0x1c1   : > { %p1715_p10 = scmp.lt.s32.totalorder %s1713_s23, %s1709_s9 }
 0x1c2   : > { %p1711_p5 = pnand %p1710_p4, %p1875_p9 }
 0x1c3   : > { %p1716_p8 = por %p1715_p10, %p1714_p7 }
 0x1c4   : > { %p1712_p6 = pneg %p1711_p5 }
 0x1c6   : > { %p1717_p0 = pnand %p1716_p8, %p1712_p6 }
 0x1c8   : > { %1720 = shalt.err (!%p1717_p0)
}
 0x1c9   : > { %1461 = dma.vmem_to_hbm [thread:$0]  (%p1875_p9), %s1261_s1, 16, %s2433_s7, %s1246_s5  }
 0x1ca PF: > { %s1272_s12 = sand.u32 1, %s1763_s15   ;;  %p2525_p1 = scmp.ge.s32.totalorder %s1783_s20, 2 }
 0x1cb   : > { %s1273_s6 = scalar_lea.sflag [#allocation5], %s1272_s12 }
 0x1cc   : > { %p1477_p3 = pnand %p2525_p1, %p1882_p11 }
 0x1ce   : > { %p1478_p13 = pneg %p1477_p3 }
 0x1d0   : > { %1758 = dma.done.wait (%p1478_p13), %s1273_s6, 16  }
 0x1d1   : > { %1760 = vsyncadd (%p1478_p13), %s1273_s6, 4294967280  ;;  %s26_s20 = sadd.s32 1, %s1783_s20   ;;  %s2526_s21 = sld [smem:[#allocation16_spill]] }
 0x1d2   : > { %p23_p12 = scmp.ge.s32.totalorder %s26_s20, 4   ;;  %s2527_s17 = sld [smem:[#allocation18_spill]] }
 0x1d3   : > { %s2528_s28 = sld [smem:[#allocation17_spill]]  ;;  %s2529_s15 = smov %s1767_s16 }
 0x1d4   : > { %s2531_s18 = smov %s1779_s19 }
 0x1d5   :  { %25 = sbr.rel (!%p23_p12) target bundleno = 12 (0xc), region = 126 }
 0x1d7   : > { %s2530_s16 = smov %s2526_s21 }
 0x1d9   : > { %s2532_s19 = smov %s2528_s28 }
 0x1da   :  { %1277 = vsyncpa [#allocation4], 1 }
 0x1db   :  { %1279 = vsyncpa [#allocation4 + $0x1], 1 }
 0x1dc   :  { %1280 = vsyncpa [#allocation7], 1 }
 0x1dd   :  { %1282 = vsyncpa [#allocation7 + $0x1], 1 }
 0x1de   :  { %1283 = vsyncpa [#allocation10], 1 }
 0x1df   :  { %1285 = vsyncpa [#allocation10 + $0x1], 1 }
 0x1e0   :  { %1286 = vsyncpa [#allocation5], 1 }
 0x1e1   :  { %1288 = vsyncpa [#allocation5 + $0x1], 1 }

</bundles_post_ra>
